<compile_context>
chip_gen: v5e
topology: v5e:2x2
jax: 0.10.0
libtpu: 0.0.40
codegen_flags: <defaults>
</compile_context>

<pallas_src>
import jax
import jax.numpy as jnp
from jax.experimental import pallas as pl
from jax.experimental.pallas import tpu as pltpu


def _entangle_kernel(alpha_ref, r_ref, a_ref, b_ref, o_ref):
    # alpha_ref: (1,) scalar parameter in SMEM.
    # r_ref/a_ref/b_ref/o_ref: (tile_rows, lanes) VMEM tiles.
    r = r_ref[...]
    da = a_ref[...] - r
    db = b_ref[...] - r

    # exp(-alpha) on a single (1, lanes) vreg row (EUP), broadcast across
    # sublanes — not a full-tile exp.  One scalar-equivalent exp per step.
    inv_scale = jnp.exp(jnp.zeros((1, r.shape[-1]), r.dtype) - alpha_ref[0])

    denom = jnp.maximum(da, db)
    # divide -> reciprocal * mul.  approx=False keeps exact IEEE rounding so
    # the 1e-5 tolerance vs. the reference holds even when denom is tiny.
    o_ref[...] = r + da + db - (da * db) * inv_scale * pl.reciprocal(
        denom, approx=False
    )


def avg_scaling_feature_entanglement(r, a, b, alpha, *, tile_bytes=1 << 20):
    """Elementwise entanglement op. r, a, b: same shape/dtype. alpha: (1,)."""
    assert r.shape == a.shape == b.shape
    assert r.dtype == a.dtype == b.dtype
    orig_shape = r.shape
    n = r.size
    assert n % 128 == 0, "total element count must be a multiple of 128"

    # Lane-dense 2D slab: widest last dim (multiple of 128) that keeps the
    # row count a multiple of 8 (full (8,128) vreg tiles); fall back to 128.
    lanes = 128
    for cand in (1024, 512, 256):
        if n % cand == 0 and (n // cand) % 8 == 0:
            lanes = cand
            break
    rows = n // lanes

    r2 = r.reshape(rows, lanes)
    a2 = a.reshape(rows, lanes)
    b2 = b.reshape(rows, lanes)
    alpha = alpha.reshape(1).astype(r.dtype)

    smem_spec = pl.BlockSpec(memory_space=pltpu.MemorySpace.SMEM)
    out_shape = jax.ShapeDtypeStruct((rows, lanes), r.dtype)

    # Rows-per-tile budget: keep each per-tensor tile <= tile_bytes (1 MiB)
    # so 4 arrays x 2 pipeline buffers stay inside the default scoped VMEM on
    # every generation (v5e 16 MiB, v6e/v7x 32 MiB) with no vmem_limit tweak.
    per_row_bytes = lanes * r.dtype.itemsize
    budget_rows = max(8, (tile_bytes // per_row_bytes) // 8 * 8)

    if rows <= budget_rows:
        # Single whole-array block, no grid: zero pipeline / per-step overhead.
        vmem_spec = pl.BlockSpec(memory_space=pltpu.MemorySpace.VMEM)
        out2 = pl.pallas_call(
            _entangle_kernel,
            out_shape=out_shape,
            in_specs=[smem_spec, vmem_spec, vmem_spec, vmem_spec],
            out_specs=vmem_spec,
        )(alpha, r2, a2, b2)
    else:
        # Large-tensor path: big tiles, 1-D parallel grid (sharded across the
        # two TensorCores on v7x; HBM-bandwidth-bound everywhere).
        tile_rows = budget_rows
        for cand in range(budget_rows, 7, -8):
            if rows % cand == 0:
                tile_rows = cand  # every block full; no ragged last block
                break
        num_tiles = pl.cdiv(rows, tile_rows)
        block = pl.BlockSpec((tile_rows, lanes), lambda i: (i, 0))
        out2 = pl.pallas_call(
            _entangle_kernel,
            out_shape=out_shape,
            grid=(num_tiles,),
            in_specs=[smem_spec, block, block, block],
            out_specs=block,
            compiler_params=pltpu.CompilerParams(
                dimension_semantics=("parallel",)
            ),
        )(alpha, r2, a2, b2)

    return out2.reshape(orig_shape)


def reference(r, a, b, alpha):
    da = a - r
    db = b - r
    return r + da + db - da * db / (jnp.maximum(da, db) * jnp.exp(alpha[0]))


if __name__ == "__main__":
    key = jax.random.PRNGKey(0)
    k_r, k_a, k_b, k_alpha = jax.random.split(key, 4)

    shape = (2, 4, 16, 16)  # NCHW, matches small PyTorch conv-style input
    r = jax.random.normal(k_r, shape, dtype=jnp.float32)
    a = jax.random.normal(k_a, shape, dtype=jnp.float32)
    b = jax.random.normal(k_b, shape, dtype=jnp.float32)
    # Deterministic parameter init (torch.randn(1) analogue).
    alpha = jax.random.normal(k_alpha, (1,), dtype=jnp.float32)

    out = avg_scaling_feature_entanglement(r, a, b, alpha)
    out = jax.block_until_ready(out)

    ref = reference(r, a, b, alpha)
    assert out.shape == shape and out.dtype == jnp.float32
    assert jnp.allclose(out, ref, rtol=1e-5, atol=1e-5), "mismatch vs reference"

    print("KERNEL_OK")
</pallas_src>

<mosaic_0001>
module attributes {stable_mosaic.version = 11 : i64} {
  func.func @_entangle_kernel(%arg0: memref<1xf32, #tpu.memory_space<smem>>, %arg1: memref<8x256xf32, #tpu.memory_space<vmem>>, %arg2: memref<8x256xf32, #tpu.memory_space<vmem>>, %arg3: memref<8x256xf32, #tpu.memory_space<vmem>>, %arg4: memref<8x256xf32, #tpu.memory_space<vmem>>) attributes {dimension_semantics = [], scalar_prefetch = 0 : i64, scratch_operands = 0 : i64, tpu.core_type = #tpu.core_type<tc>} {
    %c0 = arith.constant 0 : index
    %c0_0 = arith.constant 0 : index
    %0 = vector.load %arg1[%c0, %c0_0] : memref<8x256xf32, #tpu.memory_space<vmem>>, vector<8x256xf32>
    %c0_1 = arith.constant 0 : index
    %c0_2 = arith.constant 0 : index
    %1 = vector.load %arg2[%c0_1, %c0_2] : memref<8x256xf32, #tpu.memory_space<vmem>>, vector<8x256xf32>
    %2 = arith.subf %1, %0 : vector<8x256xf32>
    %c0_3 = arith.constant 0 : index
    %c0_4 = arith.constant 0 : index
    %3 = vector.load %arg3[%c0_3, %c0_4] : memref<8x256xf32, #tpu.memory_space<vmem>>, vector<8x256xf32>
    %4 = arith.subf %3, %0 : vector<8x256xf32>
    %cst = arith.constant 0.000000e+00 : f32
    %5 = vector.broadcast %cst : f32 to vector<1x256xf32>
    %c0_5 = arith.constant 0 : index
    %6 = memref.load %arg0[%c0_5] : memref<1xf32, #tpu.memory_space<smem>>
    %7 = vector.broadcast %6 : f32 to vector<1x256xf32>
    %8 = arith.subf %5, %7 : vector<1x256xf32>
    %9 = math.exp %8 : vector<1x256xf32>
    %10 = arith.maximumf %2, %4 : vector<8x256xf32>
    %11 = arith.addf %0, %2 : vector<8x256xf32>
    %12 = arith.addf %11, %4 : vector<8x256xf32>
    %13 = arith.mulf %2, %4 : vector<8x256xf32>
    %14 = vector.broadcast %9 : vector<1x256xf32> to vector<8x256xf32>
    %15 = arith.mulf %13, %14 : vector<8x256xf32>
    %16 = tpu.reciprocal %10 : vector<8x256xf32> -> vector<8x256xf32>
    %17 = arith.mulf %15, %16 : vector<8x256xf32>
    %18 = arith.subf %12, %17 : vector<8x256xf32>
    %c0_6 = arith.constant 0 : index
    %c0_7 = arith.constant 0 : index
    %19 = vector.load %arg4[%c0_6, %c0_7] : memref<8x256xf32, #tpu.memory_space<vmem>>, vector<8x256xf32>
    tpu.vector_store %arg4[%c0_6, %c0_7], %18 {strides = array<i32>} : memref<8x256xf32, #tpu.memory_space<vmem>>, vector<8x256xf32>,
    return
  }
}

</mosaic_0001>

<bundles_post_ra>
// kernel: tpu_custom_call.1
= control target key start
LH: loop header
LB: loop body
LE: loop exit
PB: predicated region body
PF: predicated region fallthrough
CT: control target
= control target key end

     0   :  { %10 = vsyncpa [#allocation4], 0  ;;  %s294_s0 = inlined_call_operand.<no memory space> [shape: f32[1], index: 0, kind: input, shape index: {}]   ;;  %s295_s1 = inlined_call_operand.hbm [shape: f32[8,256], index: 1, kind: input, shape index: {}]   ;;  %s296_s2 = inlined_call_operand.hbm [shape: f32[8,256], index: 2, kind: input, shape index: {}]   ;;  %s297_s3 = inlined_call_operand.hbm [shape: f32[8,256], index: 3, kind: input, shape index: {}]   ;;  %s298_s4 = inlined_call_operand.hbm [shape: f32[8,256], index: 4, kind: output, shape index: {}]  }
   0x1   :  { %11 = vsyncpa [#allocation7], 0  ;;  %s31_s17 = sshll.u32 %s296_s2, 4  ;;  %s32_s17 = int_to_ptr.hbm [resolvable:$true] %s31_s17 }
   0x2   :  { %12 = vsyncpa [#allocation5], 0  ;;  %s249_s18 = smov [#allocation6]   ;;  %s20_s22 = sshll.u32 %s295_s1, 4  ;;  %s21_s22 = int_to_ptr.hbm [resolvable:$true] %s20_s22 }
   0x3   :  { %s33_s19 = sshll.u32 %s249_s18, 4  ;;  %s250_s23 = smov [#allocation3]   ;;  %s34_s19 = int_to_ptr.vmem [resolvable:$true] %s33_s19 }
   0x4   :  { %36 = dma.hbm_to_vmem [thread:$0]  %s32_s17, 256, %s34_s19, [#allocation7]  }
   0x5   :  { %s22_s24 = sshll.u32 %s250_s23, 4  ;;  %s42_s27 = sshll.u32 %s297_s3, 4  ;;  %s23_s24 = int_to_ptr.vmem [resolvable:$true] %s22_s24  ;;  %s43_s27 = int_to_ptr.hbm [resolvable:$true] %s42_s27 }
   0x6   :  { %25 = dma.hbm_to_vmem [thread:$0]  %s21_s22, 256, %s23_s24, [#allocation4]  }
   0x7   :  { %s251_s2 = smov [#allocation8]  }
   0x8   :  { %s44_s28 = sshll.u32 %s251_s2, 4  ;;  %s45_s28 = int_to_ptr.vmem [resolvable:$true] %s44_s28 }
   0x9   :  { %47 = dma.hbm_to_vmem [thread:$0]  %s43_s27, 256, %s45_s28, [#allocation7]  }
   0xa   :  { %243 = dma.done.wait [#allocation4], 256  }
   0xb   :  { %244 = vsyncadd [#allocation4], 4294967040 }
   0xc   :  { %245 = dma.done.wait [#allocation7], 512  }
   0xd   :  { %246 = vsyncadd [#allocation7], 4294966784  ;;  %v71_v0 = vstv %s294_s0  ;;  %v60_v1 = vld [vmem:[#allocation3] sm:$0xff]  ;;  %v62_v2 = vld [vmem:[#allocation6] sm:$0xff]  ;;  %s252_s0 = smov [#allocation9]   ;;  %s126_s6 = sshll.u32 %s298_s4, 4  ;;  %s127_s6 = int_to_ptr.hbm [resolvable:$true] %s126_s6 }
   0xe   :  { %v66_v3 = vld [vmem:[#allocation8] sm:$0xff]  ;;  %v64_v4 = vsub.f32 %v62_v2, %v60_v1  ;;  %v72_v6 = vsub.f32 0.0, %v71_v0  ;;  %v61_v7 = vld [vmem:[#allocation3 + $0x8] sm:$0xff]  ;;  %v63_v8 = vld [vmem:[#allocation6 + $0x8] sm:$0xff]  ;;  %s124_s3 = sshll.u32 %s252_s0, 4  ;;  %s125_s3 = int_to_ptr.vmem [resolvable:$true] %s124_s3 }
   0xf   :  { %v68_v5 = vsub.f32 %v66_v3, %v60_v1  ;;  %v67_v9 = vld [vmem:[#allocation8 + $0x8] sm:$0xff]  ;;  %v65_v10 = vsub.f32 %v63_v8, %v61_v7 }
  0x10   :  { %v69_v11 = vsub.f32 %v67_v9, %v61_v7  ;;  %v73_v14 = vmul.f32 1.442695, %v72_v6  ;;  %v77_v24 = vadd.f32 %v64_v4, %v60_v1 }
  0x11   :  { %v75_v12 = vmax.f32 %v64_v4, %v68_v5  ;;  %v81_v18 = vmul.f32 %v68_v5, %v64_v4  ;;  %v78_v31 = vadd.f32 %v65_v10, %v61_v7 }
  0x12   :  { %v76_v13 = vmax.f32 %v65_v10, %v69_v11  ;;  %v82_v25 = vmul.f32 %v69_v11, %v65_v10  ;;  %v79_v35 = vadd.f32 %v77_v24, %v68_v5 }
  0x13   :  { %141 = vrcp.f32 %v75_v12  ;;  %vm90_vm0 = vweird.f32 %v75_v12  ;;  %v96_v19 = vand.u32 2147483648, %v75_v12  ;;  %v94_v21 = vand.u32 2147483647, %v75_v12 }
  0x14   :  { %143 = vrcp.f32 %v76_v13  ;;  %vm104_vm2 = vweird.f32 %v76_v13  ;;  %v110_v26 = vand.u32 2147483648, %v76_v13  ;;  %v108_v29 = vand.u32 2147483647, %v76_v13 }
  0x15   :  { %145 = vpow2.f32 %v73_v14  ;;  %v97_v30 = vor.u32 1.1754944e-38, %v96_v19  ;;  %vm95_vm5 = vcmp.eq.f32.partialorder %v94_v21, 8.507059e+37  ;;  %v80_v42 = vadd.f32 %v78_v31, %v69_v11 }
  0x16   :  { %v111_v36 = vor.u32 1.1754944e-38, %v110_v26  ;;  %vm109_vm7 = vcmp.eq.f32.partialorder %v108_v29, 8.507059e+37 }
  0x19   :  { %v142_v15 = vpop.eup %141 }
  0x1a   :  { %v86_v16 = vmul.f32 %v142_v15, %v75_v12  ;;  %v144_v17 = vpop.eup %143  ;;  %vm91_vm1 = vweird.f32 %v142_v15 }
  0x1b   :  { %v100_v22 = vmul.f32 %v144_v17, %v76_v13  ;;  %v146_v23 = vpop.eup %145  ;;  %vm105_vm3 = vweird.f32 %v144_v17  ;;  %vm92_vm4 = vmor %vm90_vm0, %vm91_vm1 }
  0x1c   :  { %v87_v20 = vsub.f32 1.0, %v86_v16  ;;  %v83_v32 = vmul.f32 %v146_v23, %v81_v18  ;;  %vm106_vm6 = vmor %vm104_vm2, %vm105_vm3  ;;  %v84_v38 = vmul.f32 %v146_v23, %v82_v25 }
  0x1d   :  { %v101_v28 = vsub.f32 1.0, %v100_v22 }
  0x1e   :  { %v88_v27 = vmul.f32 %v142_v15, %v87_v20 }
  0x1f   :  { %v102_v34 = vmul.f32 %v144_v17, %v101_v28 }
  0x20   :  { %v89_v33 = vadd.f32 %v142_v15, %v88_v27 }
  0x21   :  { %v103_v39 = vadd.f32 %v144_v17, %v102_v34 }
  0x22   :  { %v93_v37 = vsel %vm92_vm4, %v142_v15, %v89_v33 }
  0x23   :  { %v98_v40 = vsel %vm95_vm5, %v97_v30, %v93_v37  ;;  %v107_v43 = vsel %vm106_vm6, %v144_v17, %v103_v39 }
  0x24   :  { %v113_v41 = vmul.f32 %v98_v40, %v83_v32  ;;  %v112_v44 = vsel %vm109_vm7, %v111_v36, %v107_v43 }
  0x25   :  { %v114_v46 = vmul.f32 %v112_v44, %v84_v38 }
  0x26   :  { %v115_v45 = vsub.f32 %v79_v35, %v113_v41 }
  0x27   :  { %v116_v47 = vsub.f32 %v80_v42, %v114_v46 }
  0x28   :  { %117 = vst [vmem:[#allocation9] sm:$0xff] %v115_v45 }
  0x29   :  { %118 = vst [vmem:[#allocation9 + $0x8] sm:$0xff] %v116_v47 }
  0x2a   :  { %129 = dma.vmem_to_hbm [thread:$0]  %s125_s3, 256, %s127_s6, [#allocation5]  }
  0x2b   :  { %247 = dma.done.wait [#allocation5], 256  }
  0x2c   :  { %248 = vsyncadd [#allocation5], 4294967040 }
  0x2d   :  { %134 = vsyncpa [#allocation4], 1 }
  0x2e   :  { %135 = vsyncpa [#allocation7], 1 }
  0x2f   :  { %136 = vsyncpa [#allocation5], 1 }

</bundles_post_ra>
